<compile_context>
chip_gen: v7x
topology: tpu7x:2x2x1
jax: 0.10.0
libtpu: 0.0.40
codegen_flags: <defaults>
</compile_context>

<pallas_src>
import math

import jax
import jax.numpy as jnp
from jax.experimental import pallas as pl
from jax.experimental.pallas import tpu as pltpu


def _round_up(x: int, m: int) -> int:
    return ((x + m - 1) // m) * m


def _vmem_caps():
    """(tile-sizing budget, vmem_limit_bytes) derived from the chip's VMEM."""
    try:
        cap = int(pltpu.get_tpu_info().vmem_capacity_bytes)
    except Exception:  # interpret mode / older jaxlib: assume the v7x floor.
        cap = 64 * 1024 * 1024
    budget = min(cap // 2, 64 * 1024 * 1024)      # leave double-buffer headroom
    limit = min(cap, 64 * 1024 * 1024)            # > v5e(16M)/v6e(32M) defaults
    return budget, limit


def _pick_bank_tile(num_items: int, dim: int, k1: int, budget: int) -> int:
    """Bank tile width TN (multiple of 128) that amortizes per-step overhead
    while fitting: 2x bf16 bank tile + f32 score tile + resident emb/idx/out."""
    tb = 512                                        # nominal (upper bound) batch slab
    fixed = 2 * (tb * dim * 2 + tb * k1 * 4) + 2 * tb * k1 * 4
    per_tn = 2 * dim * 2 + tb * 4                   # bank column (x2 bufs) + score col
    tn = (budget - fixed) // per_tn
    tn = max(128, min(2048, (tn // 128) * 128))
    return min(tn, _round_up(num_items, 128))


def _nce_select_kernel(idx_ref, emb_ref, memt_ref, out_ref):
    """out[b, k] += <emb[b], memory[idx[b,k]]> restricted to this bank tile.

    idx_ref : (TB, K1) int32  global bank-row indices (resident across j)
    emb_ref : (TB, D)  bf16   embedding slab          (resident across j)
    memt_ref: (D, TN)  bf16   pre-transposed bank tile (streams with j)
    out_ref : (TB, K1) f32    raw selected dot products (accumulator)
    """
    j = pl.program_id(1)

    @pl.when(j == 0)
    def _init():
        out_ref[...] = jnp.zeros_like(out_ref)

    # Canonical (TB, D) @ (D, TN) bf16 matmul, f32 accumulation on the MXU.
    scores = jnp.dot(emb_ref[...], memt_ref[...],
                     preferred_element_type=jnp.float32)          # (TB, TN)
    tb, tn = scores.shape
    k1 = idx_ref.shape[1]

    # Global bank-row id held by each lane column of this tile.
    col = j * tn + jax.lax.broadcasted_iota(jnp.int32, (tb, tn), 1)
    k_iota = jax.lax.broadcasted_iota(jnp.int32, (tb, k1), 1)
    idx = idx_ref[...]                                            # (TB, K1)

    acc = out_ref[...]
    for k in range(k1):                 # K+1 is small & static -> unrolled
        hit = col == idx[:, k:k + 1]                              # (TB, TN)
        contrib = jnp.sum(jnp.where(hit, scores, 0.0),
                          axis=1, keepdims=True)                  # (TB, 1)
        acc = acc + jnp.where(k_iota == k, contrib, 0.0)          # -> column k
    out_ref[...] = acc


def nce_selected_scores(embedding, memt, idx, *, bank_tile, vmem_limit):
    """Raw selected scores s[b,k] = <embedding[b], memory[idx[b,k]]>  (B, K+1) f32.

    `memt` is the persistent (D, Np) bf16 pre-transposed/padded bank;
    `bank_tile` must divide Np. Only (B, K+1) values are written to HBM.
    """
    B, D = embedding.shape
    Dm, Np = memt.shape
    assert Dm == D and Np % bank_tile == 0
    K1 = idx.shape[1]
    TN = bank_tile

    # Batch slab: resident in VMEM; pad B up to TB (padded rows are sliced off
    # and never feed Z or the selected columns).
    TB = min(_round_up(max(B, 1), 8), 512)
    Bp = _round_up(B, TB)

    emb_p = embedding.astype(jnp.bfloat16)
    idx_p = idx.astype(jnp.int32)
    if Bp != B:
        emb_p = jnp.pad(emb_p, ((0, Bp - B), (0, 0)))
        idx_p = jnp.pad(idx_p, ((0, Bp - B), (0, 0)))   # padded rows select row 0

    raw = pl.pallas_call(
        _nce_select_kernel,
        out_shape=jax.ShapeDtypeStruct((Bp, K1), jnp.float32),
        grid=(Bp // TB, Np // TN),
        in_specs=[
            pl.BlockSpec((TB, K1), lambda i, j: (i, 0)),    # idx   (resident)
            pl.BlockSpec((TB, D), lambda i, j: (i, 0)),     # emb   (resident)
            pl.BlockSpec((D, TN), lambda i, j: (0, j)),     # bank  (streams)
        ],
        out_specs=pl.BlockSpec((TB, K1), lambda i, j: (i, 0)),
        compiler_params=pltpu.CompilerParams(
            dimension_semantics=("parallel", "arbitrary"),  # bank axis = reduction
            vmem_limit_bytes=vmem_limit),
    )(idx_p, emb_p, memt)
    return raw[:B]


class NCEAverageJax:
    """JAX port of vissl NCEAverage (loss_type='nce', random negative sampling)."""

    def __init__(self, memory_size, embedding_dim, num_negatives, T=0.07, Z=-1.0,
                 momentum=0.5, norm_init=True, update_mem_on_forward=True, seed=0):
        self.nLem = memory_size
        self.embedding_dim = embedding_dim
        self.update_memory_on_forward = update_mem_on_forward
        self._K = int(num_negatives)
        self._T = float(T)
        self._momentum = float(momentum)
        self._Z = float(Z) if Z > 0 else None      # cached Python float (no per-forward sync)
        # Buffer kept for fidelity with the original module ([K, T, Z, momentum]).
        self.params = jnp.array([num_negatives, T, Z, momentum], jnp.float32)

        # init_memory: uniform in [-stdv, stdv], optionally L2-normalized.
        stdv = 1.0 / math.sqrt(embedding_dim / 3)
        key = jax.random.PRNGKey(seed)
        mem = jax.random.uniform(key, (memory_size, embedding_dim),
                                 dtype=jnp.float32, minval=-stdv, maxval=stdv)
        if norm_init:
            mem = mem / jnp.linalg.norm(mem, axis=1, keepdims=True)
        self.memory = mem                            # canonical (N, D) f32 bank

        # Persistent pre-transposed, pre-padded, pre-cast (D, Np) bf16 bank fed
        # to the kernel (no per-forward cast/pad, no in-kernel XLU transpose).
        budget, self._vmem_limit = _vmem_caps()
        self._TN = _pick_bank_tile(memory_size, embedding_dim,
                                   self._K + 1, budget)
        Np = _round_up(memory_size, self._TN)
        memt = jnp.zeros((embedding_dim, Np), jnp.bfloat16)
        self._memt = memt.at[:, :memory_size].set(mem.T.astype(jnp.bfloat16))

    def do_negative_sampling(self, key, y, batch_size, num_negatives):
        # AliasMethod with uniform unigrams == uniform sampling over the bank.
        idx = jax.random.randint(key, (batch_size, num_negatives + 1), 0,
                                 self.nLem, dtype=jnp.int32)
        idx = idx.at[:, 0].set(y.astype(jnp.int32))  # column 0 is the positive
        return idx

    def update_memory(self, embedding, y):
        # TODO(synk): distributed gather_from_all has no single-device equivalent;
        # single-process semantics implemented. Duplicate labels in y are
        # last-write-wins (edge case, matches index_copy_'s unspecified order).
        m = self._momentum
        l_pos = self.memory[y] * m + embedding.astype(jnp.float32) * (1.0 - m)
        norm = jnp.clip(jnp.linalg.norm(l_pos, axis=1, keepdims=True), 1e-12)
        upd = l_pos / norm
        self.memory = self.memory.at[y].set(upd)
        # Keep the kernel-facing transposed bf16 bank in sync (B columns only).
        self._memt = self._memt.at[:, y].set(upd.T.astype(jnp.bfloat16))

    def forward(self, embedding, y, idx=None, key=None, update_memory_on_forward=None):
        assert embedding.ndim == 2
        assert embedding.shape[1] == self.memory.shape[1]
        K, T = self._K, self._T
        batch_size = embedding.shape[0]

        if idx is None:
            idx = self.do_negative_sampling(key, y, batch_size, K)

        # Hot path: fused MXU matmul + per-bank-tile selection; only (B, K+1)
        # raw scores leave the kernel.  Scale + exp applied to those only.
        raw = nce_selected_scores(embedding, self._memt, idx,
                                  bank_tile=self._TN,
                                  vmem_limit=self._vmem_limit)     # (B, K+1) f32
        out = jnp.exp(raw * (1.0 / T))

        # loss_type == 'nce': partition-function normalization.
        if self._Z is None:
            Z_dev = jnp.mean(out) * self.nLem
            out = out / Z_dev
            self._Z = float(Z_dev)                   # one-time sync (module does .item())
            self.params = self.params.at[2].set(self._Z)
        else:
            out = out / self._Z                      # Python float -> no host sync

        do_update = (update_memory_on_forward
                     if update_memory_on_forward is not None
                     else self.update_memory_on_forward)
        if do_update:
            self.update_memory(embedding, y)
        return out


def _reference_selected(embedding, memory, idx, T):
    emb = embedding.astype(jnp.float32)
    mem = memory.astype(jnp.float32)
    w = mem[idx.reshape(-1)].reshape(idx.shape[0], idx.shape[1], -1)
    out = jnp.exp(jnp.einsum("bkd,bd->bk", w, emb) / T)
    Z = jnp.mean(out) * memory.shape[0]
    return out / Z


if __name__ == "__main__":
    MEMORY_SIZE = 64      # nLem
    EMBED_DIM = 128       # embedding_dim
    NUM_NEG = 15          # K  -> K+1 = 16 scores per batch element
    BATCH = 8
    T = 0.07

    nce = NCEAverageJax(memory_size=MEMORY_SIZE, embedding_dim=EMBED_DIM,
                        num_negatives=NUM_NEG, T=T, Z=-1.0, momentum=0.5,
                        norm_init=True, update_mem_on_forward=True, seed=0)

    key = jax.random.PRNGKey(0)
    k_emb, k_idx = jax.random.split(key)
    embedding = jax.random.normal(k_emb, (BATCH, EMBED_DIM), dtype=jnp.float32)
    embedding = embedding / jnp.linalg.norm(embedding, axis=1, keepdims=True)
    y = jnp.arange(BATCH, dtype=jnp.int32)

    memory_before = nce.memory                       # snapshot for the reference
    idx = nce.do_negative_sampling(k_idx, y, BATCH, NUM_NEG)

    out = nce.forward(embedding, y, idx=idx)
    out = jax.block_until_ready(out)
    assert out.shape == (BATCH, NUM_NEG + 1)

    # Exact-semantics check against a reference using the same bf16-cast
    # operands (f32 accumulation) -- only summation order differs.
    ref_b = _reference_selected(embedding.astype(jnp.bfloat16),
                                memory_before.astype(jnp.bfloat16), idx, T)
    assert jnp.allclose(out, ref_b, rtol=1e-3, atol=1e-5), (
        f"max abs err vs bf16 ref {float(jnp.max(jnp.abs(out - ref_b)))}")

    # Loose sanity check vs the pure-f32 module math: exp(score/0.07) amplifies
    # the bf16 operand error, hence the wide tolerance (review note).
    ref_f = _reference_selected(embedding, memory_before, idx, T)
    assert jnp.allclose(out, ref_f, rtol=2e-1, atol=1e-3), (
        f"max abs err vs f32 ref {float(jnp.max(jnp.abs(out - ref_f)))}")

    # Second forward exercises the cached-Z fast path and the updated bank.
    out2 = jax.block_until_ready(nce.forward(embedding, y, idx=idx))
    assert out2.shape == (BATCH, NUM_NEG + 1)

    print("KERNEL_OK")
</pallas_src>

<mosaic_0001>
module attributes {stable_mosaic.version = 11 : i64} {
  func.func @_nce_select_kernel(%arg0: i32, %arg1: i32, %arg2: memref<8x16xi32, #tpu.memory_space<vmem>>, %arg3: memref<8x128xbf16, #tpu.memory_space<vmem>>, %arg4: memref<128x128xbf16, #tpu.memory_space<vmem>>, %arg5: memref<8x16xf32, #tpu.memory_space<vmem>>) attributes {dimension_semantics = [#tpu.dimension_semantics<parallel>, #tpu.dimension_semantics<arbitrary>], iteration_bounds = array<i64: 1, 1>, scalar_prefetch = 0 : i64, scratch_operands = 0 : i64, tpu.core_type = #tpu.core_type<tc>, window_params = [{transform_indices = @transform_0, window_bounds = array<i64: 8, 16>}, {transform_indices = @transform_1, window_bounds = array<i64: 8, 128>}, {transform_indices = @transform_2, window_bounds = array<i64: 128, 128>}, {transform_indices = @transform_3, window_bounds = array<i64: 8, 16>}]} {
    %c0_i32 = arith.constant 0 : i32
    %0 = arith.cmpi eq, %arg1, %c0_i32 : i32
    %1 = arith.extui %0 : i1 to i32
    %c0_i32_0 = arith.constant 0 : i32
    %2 = arith.cmpi ne, %1, %c0_i32_0 : i32
    scf.if %2 {
      %cst_59 = arith.constant 0.000000e+00 : f32
      %238 = vector.broadcast %cst_59 : f32 to vector<8x16xf32>
      %c0_60 = arith.constant 0 : index
      %c0_61 = arith.constant 0 : index
      %239 = vector.load %arg5[%c0_60, %c0_61] : memref<8x16xf32, #tpu.memory_space<vmem>>, vector<8x16xf32>
      tpu.vector_store %arg5[%c0_60, %c0_61], %238 {strides = array<i32>} : memref<8x16xf32, #tpu.memory_space<vmem>>, vector<8x16xf32>,
    } else {
    }
    %c0 = arith.constant 0 : index
    %c0_1 = arith.constant 0 : index
    %3 = vector.load %arg3[%c0, %c0_1] : memref<8x128xbf16, #tpu.memory_space<vmem>>, vector<8x128xbf16>
    %c0_2 = arith.constant 0 : index
    %c0_3 = arith.constant 0 : index
    %4 = vector.load %arg4[%c0_2, %c0_3] : memref<128x128xbf16, #tpu.memory_space<vmem>>, vector<128x128xbf16>
    %cst = arith.constant dense<0.000000e+00> : vector<8x128xf32>
    %5 = tpu.matmul %3, %4, %cst {dimension_numbers = #tpu.dot_dimension_numbers<[1], [0], [0], [1], [0, 0, 1, 1], [], []>} : vector<8x128xbf16>, vector<128x128xbf16>, vector<8x128xf32> -> vector<8x128xf32>
    %c128_i32 = arith.constant 128 : i32
    %6 = arith.muli %arg1, %c128_i32 : i32
    %7 = tpu.iota {dimensions = array<i32: 1>} : vector<8x128xi32>
    %8 = vector.broadcast %6 : i32 to vector<8x128xi32>
    %9 = arith.addi %8, %7 : vector<8x128xi32>
    %10 = tpu.iota {dimensions = array<i32: 1>} : vector<8x16xi32>
    %c0_4 = arith.constant 0 : index
    %c0_5 = arith.constant 0 : index
    %11 = vector.load %arg2[%c0_4, %c0_5] : memref<8x16xi32, #tpu.memory_space<vmem>>, vector<8x16xi32>
    %c0_6 = arith.constant 0 : index
    %c0_7 = arith.constant 0 : index
    %12 = vector.load %arg5[%c0_6, %c0_7] : memref<8x16xf32, #tpu.memory_space<vmem>>, vector<8x16xf32>
    %13 = vector.extract_strided_slice %11 {offsets = [0, 0], sizes = [8, 1], strides = [1, 1]} : vector<8x16xi32> to vector<8x1xi32>
    %14 = vector.broadcast %13 : vector<8x1xi32> to vector<8x128xi32>
    %15 = arith.cmpi eq, %9, %14 : vector<8x128xi32>
    %cst_8 = arith.constant 0.000000e+00 : f32
    %16 = vector.broadcast %cst_8 : f32 to vector<8x128xf32>
    %17 = arith.select %15, %5, %16 : vector<8x128xi1>, vector<8x128xf32>
    %cst_9 = arith.constant dense<0.000000e+00> : vector<8xf32>
    %18 = vector.multi_reduction <add>, %17, %cst_9 [1] : vector<8x128xf32> to vector<8xf32>
    %19 = vector.shape_cast %18 : vector<8xf32> to vector<8x1xf32>
    %c0_i32_10 = arith.constant 0 : i32
    %20 = vector.broadcast %c0_i32_10 : i32 to vector<8x16xi32>
    %21 = arith.cmpi eq, %10, %20 : vector<8x16xi32>
    %cst_11 = arith.constant 0.000000e+00 : f32
    %22 = vector.shape_cast %19 : vector<8x1xf32> to vector<8x1xf32>
    %23 = vector.broadcast %22 : vector<8x1xf32> to vector<8x16xf32>
    %24 = vector.broadcast %cst_11 : f32 to vector<8x16xf32>
    %25 = arith.select %21, %23, %24 : vector<8x16xi1>, vector<8x16xf32>
    %26 = arith.addf %12, %25 : vector<8x16xf32>
    %27 = vector.extract_strided_slice %11 {offsets = [0, 1], sizes = [8, 1], strides = [1, 1]} : vector<8x16xi32> to vector<8x1xi32>
    %28 = vector.broadcast %27 : vector<8x1xi32> to vector<8x128xi32>
    %29 = arith.cmpi eq, %9, %28 : vector<8x128xi32>
    %cst_12 = arith.constant 0.000000e+00 : f32
    %30 = vector.broadcast %cst_12 : f32 to vector<8x128xf32>
    %31 = arith.select %29, %5, %30 : vector<8x128xi1>, vector<8x128xf32>
    %cst_13 = arith.constant dense<0.000000e+00> : vector<8xf32>
    %32 = vector.multi_reduction <add>, %31, %cst_13 [1] : vector<8x128xf32> to vector<8xf32>
    %33 = vector.shape_cast %32 : vector<8xf32> to vector<8x1xf32>
    %c1_i32 = arith.constant 1 : i32
    %34 = vector.broadcast %c1_i32 : i32 to vector<8x16xi32>
    %35 = arith.cmpi eq, %10, %34 : vector<8x16xi32>
    %cst_14 = arith.constant 0.000000e+00 : f32
    %36 = vector.shape_cast %33 : vector<8x1xf32> to vector<8x1xf32>
    %37 = vector.broadcast %36 : vector<8x1xf32> to vector<8x16xf32>
    %38 = vector.broadcast %cst_14 : f32 to vector<8x16xf32>
    %39 = arith.select %35, %37, %38 : vector<8x16xi1>, vector<8x16xf32>
    %40 = arith.addf %26, %39 : vector<8x16xf32>
    %41 = vector.extract_strided_slice %11 {offsets = [0, 2], sizes = [8, 1], strides = [1, 1]} : vector<8x16xi32> to vector<8x1xi32>
    %42 = vector.broadcast %41 : vector<8x1xi32> to vector<8x128xi32>
    %43 = arith.cmpi eq, %9, %42 : vector<8x128xi32>
    %cst_15 = arith.constant 0.000000e+00 : f32
    %44 = vector.broadcast %cst_15 : f32 to vector<8x128xf32>
    %45 = arith.select %43, %5, %44 : vector<8x128xi1>, vector<8x128xf32>
    %cst_16 = arith.constant dense<0.000000e+00> : vector<8xf32>
    %46 = vector.multi_reduction <add>, %45, %cst_16 [1] : vector<8x128xf32> to vector<8xf32>
    %47 = vector.shape_cast %46 : vector<8xf32> to vector<8x1xf32>
    %c2_i32 = arith.constant 2 : i32
    %48 = vector.broadcast %c2_i32 : i32 to vector<8x16xi32>
    %49 = arith.cmpi eq, %10, %48 : vector<8x16xi32>
    %cst_17 = arith.constant 0.000000e+00 : f32
    %50 = vector.shape_cast %47 : vector<8x1xf32> to vector<8x1xf32>
    %51 = vector.broadcast %50 : vector<8x1xf32> to vector<8x16xf32>
    %52 = vector.broadcast %cst_17 : f32 to vector<8x16xf32>
    %53 = arith.select %49, %51, %52 : vector<8x16xi1>, vector<8x16xf32>
    %54 = arith.addf %40, %53 : vector<8x16xf32>
    %55 = vector.extract_strided_slice %11 {offsets = [0, 3], sizes = [8, 1], strides = [1, 1]} : vector<8x16xi32> to vector<8x1xi32>
    %56 = vector.broadcast %55 : vector<8x1xi32> to vector<8x128xi32>
    %57 = arith.cmpi eq, %9, %56 : vector<8x128xi32>
    %cst_18 = arith.constant 0.000000e+00 : f32
    %58 = vector.broadcast %cst_18 : f32 to vector<8x128xf32>
    %59 = arith.select %57, %5, %58 : vector<8x128xi1>, vector<8x128xf32>
    %cst_19 = arith.constant dense<0.000000e+00> : vector<8xf32>
    %60 = vector.multi_reduction <add>, %59, %cst_19 [1] : vector<8x128xf32> to vector<8xf32>
    %61 = vector.shape_cast %60 : vector<8xf32> to vector<8x1xf32>
    %c3_i32 = arith.constant 3 : i32
    %62 = vector.broadcast %c3_i32 : i32 to vector<8x16xi32>
    %63 = arith.cmpi eq, %10, %62 : vector<8x16xi32>
    %cst_20 = arith.constant 0.000000e+00 : f32
    %64 = vector.shape_cast %61 : vector<8x1xf32> to vector<8x1xf32>
    %65 = vector.broadcast %64 : vector<8x1xf32> to vector<8x16xf32>
    %66 = vector.broadcast %cst_20 : f32 to vector<8x16xf32>
    %67 = arith.select %63, %65, %66 : vector<8x16xi1>, vector<8x16xf32>
    %68 = arith.addf %54, %67 : vector<8x16xf32>
    %69 = vector.extract_strided_slice %11 {offsets = [0, 4], sizes = [8, 1], strides = [1, 1]} : vector<8x16xi32> to vector<8x1xi32>
    %70 = vector.broadcast %69 : vector<8x1xi32> to vector<8x128xi32>
    %71 = arith.cmpi eq, %9, %70 : vector<8x128xi32>
    %cst_21 = arith.constant 0.000000e+00 : f32
    %72 = vector.broadcast %cst_21 : f32 to vector<8x128xf32>
    %73 = arith.select %71, %5, %72 : vector<8x128xi1>, vector<8x128xf32>
    %cst_22 = arith.constant dense<0.000000e+00> : vector<8xf32>
    %74 = vector.multi_reduction <add>, %73, %cst_22 [1] : vector<8x128xf32> to vector<8xf32>
    %75 = vector.shape_cast %74 : vector<8xf32> to vector<8x1xf32>
    %c4_i32 = arith.constant 4 : i32
    %76 = vector.broadcast %c4_i32 : i32 to vector<8x16xi32>
    %77 = arith.cmpi eq, %10, %76 : vector<8x16xi32>
    %cst_23 = arith.constant 0.000000e+00 : f32
    %78 = vector.shape_cast %75 : vector<8x1xf32> to vector<8x1xf32>
    %79 = vector.broadcast %78 : vector<8x1xf32> to vector<8x16xf32>
    %80 = vector.broadcast %cst_23 : f32 to vector<8x16xf32>
    %81 = arith.select %77, %79, %80 : vector<8x16xi1>, vector<8x16xf32>
    %82 = arith.addf %68, %81 : vector<8x16xf32>
    %83 = vector.extract_strided_slice %11 {offsets = [0, 5], sizes = [8, 1], strides = [1, 1]} : vector<8x16xi32> to vector<8x1xi32>
    %84 = vector.broadcast %83 : vector<8x1xi32> to vector<8x128xi32>
    %85 = arith.cmpi eq, %9, %84 : vector<8x128xi32>
    %cst_24 = arith.constant 0.000000e+00 : f32
    %86 = vector.broadcast %cst_24 : f32 to vector<8x128xf32>
    %87 = arith.select %85, %5, %86 : vector<8x128xi1>, vector<8x128xf32>
    %cst_25 = arith.constant dense<0.000000e+00> : vector<8xf32>
    %88 = vector.multi_reduction <add>, %87, %cst_25 [1] : vector<8x128xf32> to vector<8xf32>
    %89 = vector.shape_cast %88 : vector<8xf32> to vector<8x1xf32>
    %c5_i32 = arith.constant 5 : i32
    %90 = vector.broadcast %c5_i32 : i32 to vector<8x16xi32>
    %91 = arith.cmpi eq, %10, %90 : vector<8x16xi32>
    %cst_26 = arith.constant 0.000000e+00 : f32
    %92 = vector.shape_cast %89 : vector<8x1xf32> to vector<8x1xf32>
    %93 = vector.broadcast %92 : vector<8x1xf32> to vector<8x16xf32>
    %94 = vector.broadcast %cst_26 : f32 to vector<8x16xf32>
    %95 = arith.select %91, %93, %94 : vector<8x16xi1>, vector<8x16xf32>
    %96 = arith.addf %82, %95 : vector<8x16xf32>
    %97 = vector.extract_strided_slice %11 {offsets = [0, 6], sizes = [8, 1], strides = [1, 1]} : vector<8x16xi32> to vector<8x1xi32>
    %98 = vector.broadcast %97 : vector<8x1xi32> to vector<8x128xi32>
    %99 = arith.cmpi eq, %9, %98 : vector<8x128xi32>
    %cst_27 = arith.constant 0.000000e+00 : f32
    %100 = vector.broadcast %cst_27 : f32 to vector<8x128xf32>
    %101 = arith.select %99, %5, %100 : vector<8x128xi1>, vector<8x128xf32>
    %cst_28 = arith.constant dense<0.000000e+00> : vector<8xf32>
    %102 = vector.multi_reduction <add>, %101, %cst_28 [1] : vector<8x128xf32> to vector<8xf32>
    %103 = vector.shape_cast %102 : vector<8xf32> to vector<8x1xf32>
    %c6_i32 = arith.constant 6 : i32
    %104 = vector.broadcast %c6_i32 : i32 to vector<8x16xi32>
    %105 = arith.cmpi eq, %10, %104 : vector<8x16xi32>
    %cst_29 = arith.constant 0.000000e+00 : f32
    %106 = vector.shape_cast %103 : vector<8x1xf32> to vector<8x1xf32>
    %107 = vector.broadcast %106 : vector<8x1xf32> to vector<8x16xf32>
    %108 = vector.broadcast %cst_29 : f32 to vector<8x16xf32>
    %109 = arith.select %105, %107, %108 : vector<8x16xi1>, vector<8x16xf32>
    %110 = arith.addf %96, %109 : vector<8x16xf32>
    %111 = vector.extract_strided_slice %11 {offsets = [0, 7], sizes = [8, 1], strides = [1, 1]} : vector<8x16xi32> to vector<8x1xi32>
    %112 = vector.broadcast %111 : vector<8x1xi32> to vector<8x128xi32>
    %113 = arith.cmpi eq, %9, %112 : vector<8x128xi32>
    %cst_30 = arith.constant 0.000000e+00 : f32
    %114 = vector.broadcast %cst_30 : f32 to vector<8x128xf32>
    %115 = arith.select %113, %5, %114 : vector<8x128xi1>, vector<8x128xf32>
    %cst_31 = arith.constant dense<0.000000e+00> : vector<8xf32>
    %116 = vector.multi_reduction <add>, %115, %cst_31 [1] : vector<8x128xf32> to vector<8xf32>
    %117 = vector.shape_cast %116 : vector<8xf32> to vector<8x1xf32>
    %c7_i32 = arith.constant 7 : i32
    %118 = vector.broadcast %c7_i32 : i32 to vector<8x16xi32>
    %119 = arith.cmpi eq, %10, %118 : vector<8x16xi32>
    %cst_32 = arith.constant 0.000000e+00 : f32
    %120 = vector.shape_cast %117 : vector<8x1xf32> to vector<8x1xf32>
    %121 = vector.broadcast %120 : vector<8x1xf32> to vector<8x16xf32>
    %122 = vector.broadcast %cst_32 : f32 to vector<8x16xf32>
    %123 = arith.select %119, %121, %122 : vector<8x16xi1>, vector<8x16xf32>
    %124 = arith.addf %110, %123 : vector<8x16xf32>
    %125 = vector.extract_strided_slice %11 {offsets = [0, 8], sizes = [8, 1], strides = [1, 1]} : vector<8x16xi32> to vector<8x1xi32>
    %126 = vector.broadcast %125 : vector<8x1xi32> to vector<8x128xi32>
    %127 = arith.cmpi eq, %9, %126 : vector<8x128xi32>
    %cst_33 = arith.constant 0.000000e+00 : f32
    %128 = vector.broadcast %cst_33 : f32 to vector<8x128xf32>
    %129 = arith.select %127, %5, %128 : vector<8x128xi1>, vector<8x128xf32>
    %cst_34 = arith.constant dense<0.000000e+00> : vector<8xf32>
    %130 = vector.multi_reduction <add>, %129, %cst_34 [1] : vector<8x128xf32> to vector<8xf32>
    %131 = vector.shape_cast %130 : vector<8xf32> to vector<8x1xf32>
    %c8_i32 = arith.constant 8 : i32
    %132 = vector.broadcast %c8_i32 : i32 to vector<8x16xi32>
    %133 = arith.cmpi eq, %10, %132 : vector<8x16xi32>
    %cst_35 = arith.constant 0.000000e+00 : f32
    %134 = vector.shape_cast %131 : vector<8x1xf32> to vector<8x1xf32>
    %135 = vector.broadcast %134 : vector<8x1xf32> to vector<8x16xf32>
    %136 = vector.broadcast %cst_35 : f32 to vector<8x16xf32>
    %137 = arith.select %133, %135, %136 : vector<8x16xi1>, vector<8x16xf32>
    %138 = arith.addf %124, %137 : vector<8x16xf32>
    %139 = vector.extract_strided_slice %11 {offsets = [0, 9], sizes = [8, 1], strides = [1, 1]} : vector<8x16xi32> to vector<8x1xi32>
    %140 = vector.broadcast %139 : vector<8x1xi32> to vector<8x128xi32>
    %141 = arith.cmpi eq, %9, %140 : vector<8x128xi32>
    %cst_36 = arith.constant 0.000000e+00 : f32
    %142 = vector.broadcast %cst_36 : f32 to vector<8x128xf32>
    %143 = arith.select %141, %5, %142 : vector<8x128xi1>, vector<8x128xf32>
    %cst_37 = arith.constant dense<0.000000e+00> : vector<8xf32>
    %144 = vector.multi_reduction <add>, %143, %cst_37 [1] : vector<8x128xf32> to vector<8xf32>
    %145 = vector.shape_cast %144 : vector<8xf32> to vector<8x1xf32>
    %c9_i32 = arith.constant 9 : i32
    %146 = vector.broadcast %c9_i32 : i32 to vector<8x16xi32>
    %147 = arith.cmpi eq, %10, %146 : vector<8x16xi32>
    %cst_38 = arith.constant 0.000000e+00 : f32
    %148 = vector.shape_cast %145 : vector<8x1xf32> to vector<8x1xf32>
    %149 = vector.broadcast %148 : vector<8x1xf32> to vector<8x16xf32>
    %150 = vector.broadcast %cst_38 : f32 to vector<8x16xf32>
    %151 = arith.select %147, %149, %150 : vector<8x16xi1>, vector<8x16xf32>
    %152 = arith.addf %138, %151 : vector<8x16xf32>
    %153 = vector.extract_strided_slice %11 {offsets = [0, 10], sizes = [8, 1], strides = [1, 1]} : vector<8x16xi32> to vector<8x1xi32>
    %154 = vector.broadcast %153 : vector<8x1xi32> to vector<8x128xi32>
    %155 = arith.cmpi eq, %9, %154 : vector<8x128xi32>
    %cst_39 = arith.constant 0.000000e+00 : f32
    %156 = vector.broadcast %cst_39 : f32 to vector<8x128xf32>
    %157 = arith.select %155, %5, %156 : vector<8x128xi1>, vector<8x128xf32>
    %cst_40 = arith.constant dense<0.000000e+00> : vector<8xf32>
    %158 = vector.multi_reduction <add>, %157, %cst_40 [1] : vector<8x128xf32> to vector<8xf32>
    %159 = vector.shape_cast %158 : vector<8xf32> to vector<8x1xf32>
    %c10_i32 = arith.constant 10 : i32
    %160 = vector.broadcast %c10_i32 : i32 to vector<8x16xi32>
    %161 = arith.cmpi eq, %10, %160 : vector<8x16xi32>
    %cst_41 = arith.constant 0.000000e+00 : f32
    %162 = vector.shape_cast %159 : vector<8x1xf32> to vector<8x1xf32>
    %163 = vector.broadcast %162 : vector<8x1xf32> to vector<8x16xf32>
    %164 = vector.broadcast %cst_41 : f32 to vector<8x16xf32>
    %165 = arith.select %161, %163, %164 : vector<8x16xi1>, vector<8x16xf32>
    %166 = arith.addf %152, %165 : vector<8x16xf32>
    %167 = vector.extract_strided_slice %11 {offsets = [0, 11], sizes = [8, 1], strides = [1, 1]} : vector<8x16xi32> to vector<8x1xi32>
    %168 = vector.broadcast %167 : vector<8x1xi32> to vector<8x128xi32>
    %169 = arith.cmpi eq, %9, %168 : vector<8x128xi32>
    %cst_42 = arith.constant 0.000000e+00 : f32
    %170 = vector.broadcast %cst_42 : f32 to vector<8x128xf32>
    %171 = arith.select %169, %5, %170 : vector<8x128xi1>, vector<8x128xf32>
    %cst_43 = arith.constant dense<0.000000e+00> : vector<8xf32>
    %172 = vector.multi_reduction <add>, %171, %cst_43 [1] : vector<8x128xf32> to vector<8xf32>
    %173 = vector.shape_cast %172 : vector<8xf32> to vector<8x1xf32>
    %c11_i32 = arith.constant 11 : i32
    %174 = vector.broadcast %c11_i32 : i32 to vector<8x16xi32>
    %175 = arith.cmpi eq, %10, %174 : vector<8x16xi32>
    %cst_44 = arith.constant 0.000000e+00 : f32
    %176 = vector.shape_cast %173 : vector<8x1xf32> to vector<8x1xf32>
    %177 = vector.broadcast %176 : vector<8x1xf32> to vector<8x16xf32>
    %178 = vector.broadcast %cst_44 : f32 to vector<8x16xf32>
    %179 = arith.select %175, %177, %178 : vector<8x16xi1>, vector<8x16xf32>
    %180 = arith.addf %166, %179 : vector<8x16xf32>
    %181 = vector.extract_strided_slice %11 {offsets = [0, 12], sizes = [8, 1], strides = [1, 1]} : vector<8x16xi32> to vector<8x1xi32>
    %182 = vector.broadcast %181 : vector<8x1xi32> to vector<8x128xi32>
    %183 = arith.cmpi eq, %9, %182 : vector<8x128xi32>
    %cst_45 = arith.constant 0.000000e+00 : f32
    %184 = vector.broadcast %cst_45 : f32 to vector<8x128xf32>
    %185 = arith.select %183, %5, %184 : vector<8x128xi1>, vector<8x128xf32>
    %cst_46 = arith.constant dense<0.000000e+00> : vector<8xf32>
    %186 = vector.multi_reduction <add>, %185, %cst_46 [1] : vector<8x128xf32> to vector<8xf32>
    %187 = vector.shape_cast %186 : vector<8xf32> to vector<8x1xf32>
    %c12_i32 = arith.constant 12 : i32
    %188 = vector.broadcast %c12_i32 : i32 to vector<8x16xi32>
    %189 = arith.cmpi eq, %10, %188 : vector<8x16xi32>
    %cst_47 = arith.constant 0.000000e+00 : f32
    %190 = vector.shape_cast %187 : vector<8x1xf32> to vector<8x1xf32>
    %191 = vector.broadcast %190 : vector<8x1xf32> to vector<8x16xf32>
    %192 = vector.broadcast %cst_47 : f32 to vector<8x16xf32>
    %193 = arith.select %189, %191, %192 : vector<8x16xi1>, vector<8x16xf32>
    %194 = arith.addf %180, %193 : vector<8x16xf32>
    %195 = vector.extract_strided_slice %11 {offsets = [0, 13], sizes = [8, 1], strides = [1, 1]} : vector<8x16xi32> to vector<8x1xi32>
    %196 = vector.broadcast %195 : vector<8x1xi32> to vector<8x128xi32>
    %197 = arith.cmpi eq, %9, %196 : vector<8x128xi32>
    %cst_48 = arith.constant 0.000000e+00 : f32
    %198 = vector.broadcast %cst_48 : f32 to vector<8x128xf32>
    %199 = arith.select %197, %5, %198 : vector<8x128xi1>, vector<8x128xf32>
    %cst_49 = arith.constant dense<0.000000e+00> : vector<8xf32>
    %200 = vector.multi_reduction <add>, %199, %cst_49 [1] : vector<8x128xf32> to vector<8xf32>
    %201 = vector.shape_cast %200 : vector<8xf32> to vector<8x1xf32>
    %c13_i32 = arith.constant 13 : i32
    %202 = vector.broadcast %c13_i32 : i32 to vector<8x16xi32>
    %203 = arith.cmpi eq, %10, %202 : vector<8x16xi32>
    %cst_50 = arith.constant 0.000000e+00 : f32
    %204 = vector.shape_cast %201 : vector<8x1xf32> to vector<8x1xf32>
    %205 = vector.broadcast %204 : vector<8x1xf32> to vector<8x16xf32>
    %206 = vector.broadcast %cst_50 : f32 to vector<8x16xf32>
    %207 = arith.select %203, %205, %206 : vector<8x16xi1>, vector<8x16xf32>
    %208 = arith.addf %194, %207 : vector<8x16xf32>
    %209 = vector.extract_strided_slice %11 {offsets = [0, 14], sizes = [8, 1], strides = [1, 1]} : vector<8x16xi32> to vector<8x1xi32>
    %210 = vector.broadcast %209 : vector<8x1xi32> to vector<8x128xi32>
    %211 = arith.cmpi eq, %9, %210 : vector<8x128xi32>
    %cst_51 = arith.constant 0.000000e+00 : f32
    %212 = vector.broadcast %cst_51 : f32 to vector<8x128xf32>
    %213 = arith.select %211, %5, %212 : vector<8x128xi1>, vector<8x128xf32>
    %cst_52 = arith.constant dense<0.000000e+00> : vector<8xf32>
    %214 = vector.multi_reduction <add>, %213, %cst_52 [1] : vector<8x128xf32> to vector<8xf32>
    %215 = vector.shape_cast %214 : vector<8xf32> to vector<8x1xf32>
    %c14_i32 = arith.constant 14 : i32
    %216 = vector.broadcast %c14_i32 : i32 to vector<8x16xi32>
    %217 = arith.cmpi eq, %10, %216 : vector<8x16xi32>
    %cst_53 = arith.constant 0.000000e+00 : f32
    %218 = vector.shape_cast %215 : vector<8x1xf32> to vector<8x1xf32>
    %219 = vector.broadcast %218 : vector<8x1xf32> to vector<8x16xf32>
    %220 = vector.broadcast %cst_53 : f32 to vector<8x16xf32>
    %221 = arith.select %217, %219, %220 : vector<8x16xi1>, vector<8x16xf32>
    %222 = arith.addf %208, %221 : vector<8x16xf32>
    %223 = vector.extract_strided_slice %11 {offsets = [0, 15], sizes = [8, 1], strides = [1, 1]} : vector<8x16xi32> to vector<8x1xi32>
    %224 = vector.broadcast %223 : vector<8x1xi32> to vector<8x128xi32>
    %225 = arith.cmpi eq, %9, %224 : vector<8x128xi32>
    %cst_54 = arith.constant 0.000000e+00 : f32
    %226 = vector.broadcast %cst_54 : f32 to vector<8x128xf32>
    %227 = arith.select %225, %5, %226 : vector<8x128xi1>, vector<8x128xf32>
    %cst_55 = arith.constant dense<0.000000e+00> : vector<8xf32>
    %228 = vector.multi_reduction <add>, %227, %cst_55 [1] : vector<8x128xf32> to vector<8xf32>
    %229 = vector.shape_cast %228 : vector<8xf32> to vector<8x1xf32>
    %c15_i32 = arith.constant 15 : i32
    %230 = vector.broadcast %c15_i32 : i32 to vector<8x16xi32>
    %231 = arith.cmpi eq, %10, %230 : vector<8x16xi32>
    %cst_56 = arith.constant 0.000000e+00 : f32
    %232 = vector.shape_cast %229 : vector<8x1xf32> to vector<8x1xf32>
    %233 = vector.broadcast %232 : vector<8x1xf32> to vector<8x16xf32>
    %234 = vector.broadcast %cst_56 : f32 to vector<8x16xf32>
    %235 = arith.select %231, %233, %234 : vector<8x16xi1>, vector<8x16xf32>
    %236 = arith.addf %222, %235 : vector<8x16xf32>
    %c0_57 = arith.constant 0 : index
    %c0_58 = arith.constant 0 : index
    %237 = vector.load %arg5[%c0_57, %c0_58] : memref<8x16xf32, #tpu.memory_space<vmem>>, vector<8x16xf32>
    tpu.vector_store %arg5[%c0_57, %c0_58], %236 {strides = array<i32>} : memref<8x16xf32, #tpu.memory_space<vmem>>, vector<8x16xf32>,
    return
  }
  func.func @transform_0(%arg0: i32, %arg1: i32) -> (i32, i32) {
    %c0_i32 = arith.constant 0 : i32
    %c0_i32_0 = arith.constant 0 : i32
    return %arg0, %c0_i32 : i32, i32
  }
  func.func @transform_1(%arg0: i32, %arg1: i32) -> (i32, i32) {
    %c0_i32 = arith.constant 0 : i32
    %c0_i32_0 = arith.constant 0 : i32
    return %arg0, %c0_i32 : i32, i32
  }
  func.func @transform_2(%arg0: i32, %arg1: i32) -> (i32, i32) {
    %c0_i32 = arith.constant 0 : i32
    %c0_i32_0 = arith.constant 0 : i32
    return %c0_i32, %arg1 : i32, i32
  }
  func.func @transform_3(%arg0: i32, %arg1: i32) -> (i32, i32) {
    %c0_i32 = arith.constant 0 : i32
    %c0_i32_0 = arith.constant 0 : i32
    return %arg0, %c0_i32 : i32, i32
  }
}

</mosaic_0001>

<bundles_post_ra>
// kernel: tpu_custom_call.1
= control target key start
LH: loop header
LB: loop body
LE: loop exit
PB: predicated region body
PF: predicated region fallthrough
CT: control target
= control target key end

     0   :  { %8 = vsyncpa [#allocation3], 0  ;;  %s705_s0 = inlined_call_operand.hbm [shape: s32[8,16], index: 0, kind: input, shape index: {}]   ;;  %s706_s1 = inlined_call_operand.hbm [shape: bf16[8,128], index: 1, kind: input, shape index: {}]   ;;  %s707_s2 = inlined_call_operand.hbm [shape: bf16[128,128], index: 2, kind: input, shape index: {}]   ;;  %s708_s3 = inlined_call_operand.hbm [shape: f32[8,16], index: 3, kind: output, shape index: {}]  }
   0x1   :  { %9 = vsyncpa [#allocation6], 0 }
   0x2   :  { %10 = vsyncpa [#allocation4], 0  ;;  %s529_s12 = smov [#allocation5]   ;;  %s530_s14 = smov [#allocation2]  }
   0x3   :  { %s27_s13 = sshll.u32 %s529_s12, 4  ;;  %s17_s15 = sshll.u32 %s530_s14, 4  ;;  %s28_s13 = int_to_ptr.vmem [resolvable:$true] %s27_s13  ;;  %s18_s15 = int_to_ptr.vmem [resolvable:$true] %s17_s15 }
   0x4   :  { %s435_s18 = scalar_lea.hbm %s706_s1, 64 }
   0x5   :  { %p436_p0 = scmp.ne.s32.totalorder %s706_s1, %s435_s18  ;;  %p439_p1 = scmp.lt.u32.totalorder %s435_s18, %s706_s1 }
   0x7   :  { %p441_p2 = pnand %p439_p1, %p436_p0 }
   0x9   :  { %444 = shalt.err (!%p441_p2)
}
   0xa   :  { %s445_s23 = scalar_lea.vmem %s28_s13, 64  ;;  %p450_p4 = scmp.lt.s32.totalorder %s28_s13, %s28_s13 }
   0xb   :  { %p446_p3 = scmp.ne.s32.totalorder %s28_s13, %s445_s23  ;;  %p451_p5 = scmp.lt.s32.totalorder %s445_s23, %s445_s23 }
   0xd   :  { %p452_p6 = por %p451_p5, %p450_p4 }
   0xf   :  { %p453_p7 = pnand %p452_p6, %p446_p3 }
  0x11   :  { %456 = shalt.err (!%p453_p7)
}
  0x12   :  { %30 = dma.hbm_to_vmem [thread:$0]  %s706_s1, 64, %s28_s13, [#allocation6]  }
  0x13   :  { %s457_s28 = scalar_lea.hbm %s705_s0, 128 }
  0x14   :  { %p458_p8 = scmp.ne.s32.totalorder %s705_s0, %s457_s28  ;;  %p461_p9 = scmp.lt.u32.totalorder %s457_s28, %s705_s0 }
  0x16   :  { %p463_p10 = pnand %p461_p9, %p458_p8 }
  0x18   :  { %466 = shalt.err (!%p463_p10)
}
  0x19   :  { %s467_s6 = scalar_lea.vmem %s18_s15, 128  ;;  %p472_p12 = scmp.lt.s32.totalorder %s18_s15, %s18_s15 }
  0x1a   :  { %p468_p11 = scmp.ne.s32.totalorder %s18_s15, %s467_s6  ;;  %p473_p13 = scmp.lt.s32.totalorder %s467_s6, %s467_s6 }
  0x1c   :  { %p474_p0 = por %p473_p13, %p472_p12 }
  0x1e   :  { %p475_p1 = pnand %p474_p0, %p468_p11 }
  0x20   :  { %478 = shalt.err (!%p475_p1)
}
  0x21   :  { %20 = dma.hbm_to_vmem [thread:$0]  %s705_s0, 128, %s18_s15, [#allocation3]  }
  0x22   :  { %s531_s8 = smov [#allocation7]   ;;  %s479_s12 = scalar_lea.hbm %s707_s2, 1024 }
  0x23   :  { %s36_s9 = sshll.u32 %s531_s8, 4  ;;  %p480_p2 = scmp.ne.s32.totalorder %s707_s2, %s479_s12  ;;  %s37_s9 = int_to_ptr.vmem [resolvable:$true] %s36_s9 }
  0x24   :  { %p483_p3 = scmp.lt.u32.totalorder %s479_s12, %s707_s2 }
  0x26   :  { %p485_p4 = pnand %p483_p3, %p480_p2 }
  0x28   :  { %488 = shalt.err (!%p485_p4)
}
  0x29   :  { %s489_s18 = scalar_lea.vmem %s37_s9, 1024  ;;  %p494_p6 = scmp.lt.s32.totalorder %s37_s9, %s37_s9 }
  0x2a   :  { %p490_p5 = scmp.ne.s32.totalorder %s37_s9, %s489_s18  ;;  %p495_p7 = scmp.lt.s32.totalorder %s489_s18, %s489_s18 }
  0x2c   :  { %p496_p8 = por %p495_p7, %p494_p6 }
  0x2e   :  { %p497_p9 = pnand %p496_p8, %p490_p5 }
  0x30   :  { %500 = shalt.err (!%p497_p9)
}
  0x31   :  { %s532_s0 = smov 64   ;;  %s533_s15 = smov 4  }
  0x32   :  { %42 = dma.hbm_to_vmem [thread:$0]  %s707_s2, 1024, %s37_s9, [#allocation6], %s532_s0, %s532_s0, %s533_s15  }
  0x33   :  { %523 = dma.done.wait [#allocation3], 128  }
  0x34   :  { %524 = vsyncadd [#allocation3], 4294967168 }
  0x35   :  { %525 = dma.done.wait [#allocation6], 1088  }
  0x36   :  { %526 = vsyncadd [#allocation6], 4294966208  ;;  %v534_v0 = vmov 0.0   ;;  %vm535_vm0 = vmmov 0   ;;  %v536_v1 = vmov 1   ;;  %v537_v2 = vmov 0  }
  0x37   :  { %366 = vmatprep.subr.bf16.mxu0 %v534_v0  ;;  %382 = vmatprep.mubr.msk.bf16.mxu0 %vm535_vm0, %v534_v0  ;;  %v427_v3 = vld [vmem:[#allocation7] sm:$0xff]   ;;  %v428_v4 = vld [vmem:[#allocation7 + $0x8] sm:$0xff]   ;;  %v429_v5 = vld [vmem:[#allocation7 + $0x10] sm:$0xff]   ;;  %v538_v8 = vmov 3   ;;  %v539_v9 = vmov 2   ;;  %v540_v12 = vmov 5   ;;  %v165_v26 = vlaneseq }
  0x38   :  { %411 = vset.pattern.permute.xlu1 %v536_v1  ;;  %410 = vset.pattern.permute.xlu0 %v537_v2  ;;  %v613_v6 = vld [vmem:[#allocation2] sm:$0xff]  ;;  %v431_v10 = vld [vmem:[#allocation7 + $0x20] sm:$0xff]   ;;  %v432_v11 = vld [vmem:[#allocation7 + $0x28] sm:$0xff]   ;;  %v541_v13 = vmov 4   ;;  %v542_v15 = vmov 7   ;;  %v543_v16 = vmov 6  }
  0x39   :  { %367 = vmatpush3.bf16.msra.mxu0 %v427_v3  ;;  %182 = vperm.xlu1 %411, %v613_v6   ;;  %v430_v7 = vld [vmem:[#allocation7 + $0x18] sm:$0xff]   ;;  %v433_v14 = vld [vmem:[#allocation7 + $0x30] sm:$0xff]   ;;  %v544_v18 = vmov 8   ;;  %v545_v20 = vmov 9   ;;  %v546_v21 = vmov 10   ;;  %v547_v22 = vmov 11  }
  0x3a   :  { %368 = vmatprep.subr.bf16.mxu0 %v534_v0  ;;  %172 = vperm.xlu0 %410, %v613_v6   ;;  %v434_v17 = vld [vmem:[#allocation7 + $0x38] sm:$0xff]   ;;  %v548_v23 = vmov 12   ;;  %v631_v29 = vand.u32 127, %v165_v26  ;;  %vm57_vm8 = vcmask 130048   ;;  %v549_v52 = vmov 14   ;;  %s552_s2 = smov [#allocation8]  }
  0x3b   :  { %v59_v19 = vld [vmem:[#allocation5] sm:$0xf]  ;;  %58 = vst.msk [vmem:[#allocation8] sm:$0xff] %vm57_vm8, %v534_v0  ;;  %v550_v53 = vmov 13   ;;  %v551_v54 = vmov 15   ;;  %s339_s21 = sshll.u32 %s552_s2, 4  ;;  %s340_s21 = int_to_ptr.vmem [resolvable:$true] %s339_s21 }
  0x3c   :  { %vm178_vm13 = vcmp.eq.s32.totalorder %v631_v29, 0  ;;  %vm188_vm14 = vcmp.eq.s32.totalorder %v631_v29, 1  ;;  %vm198_vm15 = vcmp.eq.s32.totalorder %v631_v29, 2  ;;  %vm208_vm0 = vcmp.eq.s32.totalorder %v631_v29, 3  ;;  %s501_s22 = scalar_lea.vmem %s340_s21, 128  ;;  %p506_p11 = scmp.lt.s32.totalorder %s340_s21, %s340_s21 }
  0x3d   :  { %369 = vmatpush3.bf16.msra.mxu0 %v428_v4  ;;  %413 = vset.pattern.permute.xlu1 %v538_v8  ;;  %p502_p10 = scmp.ne.s32.totalorder %s340_s21, %s501_s22  ;;  %p507_p12 = scmp.lt.s32.totalorder %s501_s22, %s501_s22 }
  0x3e   :  { %370 = vmatprep.subr.bf16.mxu0 %v534_v0  ;;  %412 = vset.pattern.permute.xlu0 %v539_v9 }
  0x3f   :  { %202 = vperm.xlu1 %413, %v613_v6   ;;  %192 = vperm.xlu0 %412, %v613_v6   ;;  %p508_p13 = por %p507_p12, %p506_p11 }
  0x41   :  { %371 = vmatpush3.bf16.msra.mxu0 %v429_v5  ;;  %p509_p0 = pnand %p508_p13, %p502_p10 }
  0x42   :  { %372 = vmatprep.subr.bf16.mxu0 %v534_v0  ;;  %v170_v55 = vld [vmem:[#allocation8] sm:$0xff] }
  0x43   :  { %415 = vset.pattern.permute.xlu1 %v540_v12  ;;  %414 = vset.pattern.permute.xlu0 %v541_v13 }
  0x44   :  { %222 = vperm.xlu1 %415, %v613_v6   ;;  %212 = vperm.xlu0 %414, %v613_v6  }
  0x45   :  { %373 = vmatpush3.bf16.msra.mxu0 %v430_v7 }
  0x46   :  { %374 = vmatprep.subr.bf16.mxu0 %v534_v0 }
  0x48   :  { %417 = vset.pattern.permute.xlu1 %v542_v15  ;;  %416 = vset.pattern.permute.xlu0 %v543_v16 }
  0x49   :  { %375 = vmatpush3.bf16.msra.mxu0 %v431_v10  ;;  %242 = vperm.xlu1 %417, %v613_v6  }
  0x4a   :  { %376 = vmatprep.subr.bf16.mxu0 %v534_v0  ;;  %232 = vperm.xlu0 %416, %v613_v6  }
  0x4d   :  { %377 = vmatpush3.bf16.msra.mxu0 %v432_v11  ;;  %418 = vset.pattern.permute.xlu1 %v544_v18 }
  0x4e   :  { %378 = vmatprep.subr.bf16.mxu0 %v534_v0  ;;  %252 = vperm.xlu1 %418, %v613_v6  }
  0x4f   :  { %419 = vset.pattern.permute.xlu0 %v545_v20 }
  0x50   :  { %262 = vperm.xlu0 %419, %v613_v6  }
  0x51   :  { %379 = vmatpush3.bf16.msra.mxu0 %v433_v14 }
  0x52   :  { %380 = vmatprep.subr.bf16.mxu0 %v534_v0  ;;  %420 = vset.pattern.permute.xlu1 %v546_v21 }
  0x53   :  { %272 = vperm.xlu1 %420, %v613_v6  }
  0x54   :  { %421 = vset.pattern.permute.xlu0 %v547_v22 }
  0x55   :  { %381 = vmatpush3.bf16.msra.mxu0 %v434_v17 }
  0x57   :  { %422 = vset.pattern.permute.xlu1 %v548_v23 }
  0x58   :  { %383 = vmatmul.mubr.bf16.vlgmr.msra.gmra.mrb[0].mxu0 %v59_v19 }
  0xb8   :  { %v183_v24 = vpop.permute.xlu1 %182 }
  0xb9   :  { %v173_v25 = vpop.permute.xlu0 %172  ;;  %vm184_vm1 = vcmp.eq.s32.totalorder %v631_v29, %v183_v24 }
  0xba   :  { %vm174_vm2 = vcmp.eq.s32.totalorder %v631_v29, %v173_v25 }
  0xbe   :  { %v203_v27 = vpop.permute.xlu1 %202  ;;  %v193_v28 = vpop.permute.xlu0 %192 }
  0xbf   :  { %vm194_vm3 = vcmp.eq.s32.totalorder %v631_v29, %v193_v28  ;;  %vm204_vm6 = vcmp.eq.s32.totalorder %v631_v29, %v203_v27 }
  0xc3   :  { %v223_v30 = vpop.permute.xlu1 %222  ;;  %v213_v32 = vpop.permute.xlu0 %212 }
  0xc4   :  { %vm214_vm4 = vcmp.eq.s32.totalorder %v631_v29, %v213_v32  ;;  %vm224_vm7 = vcmp.eq.s32.totalorder %v631_v29, %v223_v30 }
  0xc8   :  { %v243_v38 = vpop.permute.xlu1 %242 }
  0xc9   :  { %vm244_vm5 = vcmp.eq.s32.totalorder %v631_v29, %v243_v38  ;;  %v233_v43 = vpop.permute.xlu0 %232 }
  0xca   :  { %vm234_vm9 = vcmp.eq.s32.totalorder %v631_v29, %v233_v43 }
  0xcd   :  { %v253_v45 = vpop.permute.xlu1 %252 }
  0xce   :  { %vm254_vm10 = vcmp.eq.s32.totalorder %v631_v29, %v253_v45 }
  0xcf   :  { %v263_v47 = vpop.permute.xlu0 %262 }
  0xd0   :  { %vm264_vm11 = vcmp.eq.s32.totalorder %v631_v29, %v263_v47 }
  0xd2   :  { %v273_v49 = vpop.permute.xlu1 %272 }
  0xd3   :  { %vm274_vm12 = vcmp.eq.s32.totalorder %v631_v29, %v273_v49 }
 0x12b   :  { %v635_v31 = vpop.f32.mrb[0].mxu0 }
 0x12c   :  { %v384_v33 = vpop.f32.mrb[1].mxu0  ;;  %v185_v34 = vsel %vm184_vm1, %v635_v31, 0.0  ;;  %v175_v35 = vsel %vm174_vm2, %v635_v31, 0.0  ;;  %v195_v39 = vsel %vm194_vm3, %v635_v31, 0.0  ;;  %v215_v40 = vsel %vm214_vm4, %v635_v31, 0.0 }
 0x12d   :  { %186 = vadd.xlane.f32.xlu1 %v185_v34  ;;  %176 = vadd.xlane.f32.xlu0 %v175_v35  ;;  %v161_v36 = vpop.f32.mrb[2].mxu0  ;;  %v205_v41 = vsel %vm204_vm6, %v635_v31, 0.0  ;;  %v245_v42 = vsel %vm244_vm5, %v635_v31, 0.0  ;;  %v225_v44 = vsel %vm224_vm7, %v635_v31, 0.0  ;;  %v235_v46 = vsel %vm234_vm9, %v635_v31, 0.0 }
 0x12e   :  { %v385_v37 = vpop.f32.mrb[3].mxu0  ;;  %v255_v48 = vsel %vm254_vm10, %v635_v31, 0.0  ;;  %v265_v50 = vsel %vm264_vm11, %v635_v31, 0.0  ;;  %v275_v51 = vsel %vm274_vm12, %v635_v31, 0.0  ;;  %vm218_vm1 = vcmp.eq.s32.totalorder %v631_v29, 4 }
 0x12f   :  { %vm228_vm2 = vcmp.eq.s32.totalorder %v631_v29, 5  ;;  %vm238_vm3 = vcmp.eq.s32.totalorder %v631_v29, 6  ;;  %vm248_vm4 = vcmp.eq.s32.totalorder %v631_v29, 7  ;;  %vm258_vm6 = vcmp.eq.s32.totalorder %v631_v29, 8 }
 0x130   :  { %vm268_vm7 = vcmp.eq.s32.totalorder %v631_v29, 9  ;;  %vm278_vm9 = vcmp.eq.s32.totalorder %v631_v29, 10 }
 0x131   :  { %196 = vadd.xlane.f32.xlu1 %v195_v39  ;;  %216 = vadd.xlane.f32.xlu0 %v215_v40 }
 0x135   :  { %206 = vadd.xlane.f32.xlu1 %v205_v41  ;;  %246 = vadd.xlane.f32.xlu0 %v245_v42 }
 0x139   :  { %226 = vadd.xlane.f32.xlu1 %v225_v44 }
 0x13d   :  { %236 = vadd.xlane.f32.xlu1 %v235_v46 }
 0x141   :  { %256 = vadd.xlane.f32.xlu1 %v255_v48 }
 0x145   :  { %266 = vadd.xlane.f32.xlu1 %v265_v50 }
 0x149   :  { %276 = vadd.xlane.f32.xlu1 %v275_v51 }
 0x14b   :  { %282 = vperm.xlu0 %421, %v613_v6  }
 0x14f   :  { %423 = vset.pattern.permute.xlu0 %v550_v53 }
 0x15a   :  { %292 = vperm.xlu1 %422, %v613_v6  }
 0x15e   :  { %424 = vset.pattern.permute.xlu1 %v549_v52 }
 0x15f   :  { %312 = vperm.xlu1 %424, %v613_v6  }
 0x163   :  { %425 = vset.pattern.permute.xlu1 %v551_v54 }
 0x164   :  { %322 = vperm.xlu1 %425, %v613_v6  }
 0x1ba   :  { %v187_v56 = vpop.xlane.xlu1 %186  ;;  %v177_v57 = vpop.xlane.xlu0 %176 }
 0x1bb   :  { %v179_v58 = vsel %vm178_vm13, %v177_v57, 0.0  ;;  %v189_v60 = vsel %vm188_vm14, %v187_v56, 0.0  ;;  %vm288_vm13 = vcmp.eq.s32.totalorder %v631_v29, 11 }
 0x1bc   :  { %v180_v59 = vadd.f32 %v179_v58, %v170_v55 }
 0x1be   :  { %v197_v61 = vpop.xlane.xlu1 %196  ;;  %v190_v62 = vadd.f32 %v189_v60, %v180_v59  ;;  %v217_v1 = vpop.xlane.xlu0 %216 }
 0x1bf   :  { %v199_v63 = vsel %vm198_vm15, %v197_v61, 0.0  ;;  %v219_v5 = vsel %vm218_vm1, %v217_v1, 0.0  ;;  %vm298_vm15 = vcmp.eq.s32.totalorder %v631_v29, 12  ;;  %vm318_vm1 = vcmp.eq.s32.totalorder %v631_v29, 14 }
 0x1c0   :  { %v200_v0 = vadd.f32 %v199_v63, %v190_v62 }
 0x1c2   :  { %v207_v2 = vpop.xlane.xlu1 %206  ;;  %v247_v7 = vpop.xlane.xlu0 %246 }
 0x1c3   :  { %v209_v3 = vsel %vm208_vm0, %v207_v2, 0.0  ;;  %v249_v17 = vsel %vm248_vm4, %v247_v7, 0.0  ;;  %vm308_vm0 = vcmp.eq.s32.totalorder %v631_v29, 13 }
 0x1c4   :  { %v210_v4 = vadd.f32 %v209_v3, %v200_v0 }
 0x1c6   :  { %v227_v8 = vpop.xlane.xlu1 %226  ;;  %v220_v9 = vadd.f32 %v219_v5, %v210_v4 }
 0x1c7   :  { %v229_v10 = vsel %vm228_vm2, %v227_v8, 0.0  ;;  %vm328_vm2 = vcmp.eq.s32.totalorder %v631_v29, 15 }
 0x1c8   :  { %v230_v11 = vadd.f32 %v229_v10, %v220_v9 }
 0x1ca   :  { %v237_v12 = vpop.xlane.xlu1 %236  ;;  %v283_v13 = vpop.permute.xlu0 %282 }
 0x1cb   :  { %v239_v14 = vsel %vm238_vm3, %v237_v12, 0.0  ;;  %vm284_vm5 = vcmp.eq.s32.totalorder %v631_v29, %v283_v13 }
 0x1cc   :  { %v240_v15 = vadd.f32 %v239_v14, %v230_v11  ;;  %v285_v16 = vsel %vm284_vm5, %v635_v31, 0.0 }
 0x1cd   :  { %286 = vadd.xlane.f32.xlu0 %v285_v16 }
 0x1ce   :  { %v257_v18 = vpop.xlane.xlu1 %256  ;;  %v250_v19 = vadd.f32 %v249_v17, %v240_v15 }
 0x1cf   :  { %v259_v20 = vsel %vm258_vm6, %v257_v18, 0.0 }
 0x1d0   :  { %v260_v21 = vadd.f32 %v259_v20, %v250_v19 }
 0x1d2   :  { %v267_v22 = vpop.xlane.xlu1 %266 }
 0x1d3   :  { %v269_v23 = vsel %vm268_vm7, %v267_v22, 0.0 }
 0x1d4   :  { %v270_v24 = vadd.f32 %v269_v23, %v260_v21 }
 0x1d6   :  { %v277_v25 = vpop.xlane.xlu1 %276 }
 0x1d7   :  { %v279_v26 = vsel %vm278_vm9, %v277_v25, 0.0 }
 0x1d8   :  { %v280_v27 = vadd.f32 %v279_v26, %v270_v24 }
 0x1da   :  { %v293_v28 = vpop.permute.xlu1 %292 }
 0x1db   :  { %vm294_vm10 = vcmp.eq.s32.totalorder %v631_v29, %v293_v28 }
 0x1dc   :  { %v295_v30 = vsel %vm294_vm10, %v635_v31, 0.0 }
 0x1dd   :  { %296 = vadd.xlane.f32.xlu1 %v295_v30 }
 0x1de   :  { %v313_v32 = vpop.permute.xlu1 %312 }
 0x1df   :  { %vm314_vm11 = vcmp.eq.s32.totalorder %v631_v29, %v313_v32 }
 0x1e0   :  { %v315_v33 = vsel %vm314_vm11, %v635_v31, 0.0 }
 0x1e1   :  { %316 = vadd.xlane.f32.xlu1 %v315_v33 }
 0x1e3   :  { %v323_v34 = vpop.permute.xlu1 %322  ;;  %302 = vperm.xlu0 %423, %v613_v6  }
 0x1e4   :  { %vm324_vm12 = vcmp.eq.s32.totalorder %v631_v29, %v323_v34 }
 0x1e5   :  { %v325_v35 = vsel %vm324_vm12, %v635_v31, 0.0 }
 0x1e6   :  { %326 = vadd.xlane.f32.xlu1 %v325_v35 }
 0x1e7   :  { %426 = vset.pattern.permute.xlu0 %v551_v54 }
 0x25a   :  { %v287_v36 = vpop.xlane.xlu0 %286 }
 0x25b   :  { %v289_v37 = vsel %vm288_vm13, %v287_v36, 0.0 }
 0x25c   :  { %v290_v38 = vadd.f32 %v289_v37, %v280_v27 }
 0x262   :  { %v303_v39 = vpop.permute.xlu0 %302 }
 0x263   :  { %vm304_vm14 = vcmp.eq.s32.totalorder %v631_v29, %v303_v39 }
 0x264   :  { %v305_v40 = vsel %vm304_vm14, %v635_v31, 0.0 }
 0x265   :  { %306 = vadd.xlane.f32.xlu0 %v305_v40 }
 0x26a   :  { %v297_v41 = vpop.xlane.xlu1 %296 }
 0x26b   :  { %v299_v42 = vsel %vm298_vm15, %v297_v41, 0.0 }
 0x26c   :  { %v300_v43 = vadd.f32 %v299_v42, %v290_v38 }
 0x26e   :  { %v317_v6 = vpop.xlane.xlu1 %316 }
 0x26f   :  { %v319_v48 = vsel %vm318_vm1, %v317_v6, 0.0 }
 0x273   :  { %v327_v46 = vpop.xlane.xlu1 %326 }
 0x274   :  { %v329_v49 = vsel %vm328_vm2, %v327_v46, 0.0 }
 0x2f2   :  { %v307_v44 = vpop.xlane.xlu0 %306 }
 0x2f3   :  { %v309_v45 = vsel %vm308_vm0, %v307_v44, 0.0 }
 0x2f4   :  { %v310_v47 = vadd.f32 %v309_v45, %v300_v43 }
 0x2f6   :  { %v320_v31 = vadd.f32 %v319_v48, %v310_v47 }
 0x2f8   :  { %v330_v50 = vadd.f32 %v329_v49, %v320_v31 }
 0x2fa   :  { %332 = vst.msk [vmem:[#allocation8] sm:$0xff] %vm57_vm8, %v330_v50 }
 0x2fb   :  { %512 = shalt.err (!%p509_p0)
}
 0x2fc   :  { %s513_s25 = scalar_lea.hbm %s708_s3, 128 }
 0x2fd   :  { %p514_p1 = scmp.ne.s32.totalorder %s708_s3, %s513_s25  ;;  %p517_p2 = scmp.lt.u32.totalorder %s513_s25, %s708_s3 }
 0x2ff   :  { %p519_p3 = pnand %p517_p2, %p514_p1 }
 0x301   :  { %522 = shalt.err (!%p519_p3)
}
 0x302   :  { %342 = dma.vmem_to_hbm [thread:$0]  %s340_s21, 128, %s708_s3, [#allocation4]  }
 0x303   :  { %527 = dma.done.wait [#allocation4], 128  }
 0x304   :  { %528 = vsyncadd [#allocation4], 4294967168 }
 0x305   :  { %346 = vsyncpa [#allocation3], 1 }
 0x306   :  { %347 = vsyncpa [#allocation6], 1 }
 0x307   :  { %348 = vsyncpa [#allocation4], 1 }

</bundles_post_ra>
